<compile_context>
chip_gen: v5e
topology: v5e:2x2
jax: 0.10.0
libtpu: 0.0.40
codegen_flags: <defaults>
</compile_context>

<pallas_src>
import jax
import jax.numpy as jnp
from jax.experimental import pallas as pl
from jax.experimental.pallas import tpu as pltpu


def sinusoid_mlp_kernel(x_ref, w1_ref, b1_ref, w2_ref, b2_ref, w3_ref, b3_ref, o_ref):
    x = x_ref[...]                                                     # (TB, 1)

    # Layer 1: (TB,1) x (1,D) outer product -> pure VALU broadcast multiply.
    h1 = jnp.maximum(x * w1_ref[...] + b1_ref[...], 0.0)               # (TB, D)

    # Layer 2: the only real matmul -> MXU with f32 accumulation.
    h2 = jnp.dot(h1, w2_ref[...], preferred_element_type=jnp.float32)  # (TB, D)
    h2 = jnp.maximum(h2 + b2_ref[...], 0.0)

    # Layer 3: N=1 output -> elementwise multiply (VPU) + lane reduction (XLU).
    out = jnp.sum(h2 * w3_ref[...], axis=-1, keepdims=True)            # (TB, 1)
    o_ref[...] = (out + b3_ref[0, 0]).astype(o_ref.dtype)


def sinusoid_mlp(x, w1, b1, w2, b2, w3, b3, *, block_b=512):
    """x: (B, 1) f32. Weights in (in, out) layout: w1 (1,dim), w2 (dim,dim),
    w3 (dim,1); biases b1/b2 (1,dim), b3 (1,1)."""
    B = x.shape[0]
    dim = w1.shape[1]
    out_dtype = x.dtype

    # --- pad hidden dim to a lane-aligned multiple of 128 (zeros are inert
    #     through ReLU / matmul / final reduction, so semantics are preserved).
    D = max(128, ((dim + 127) // 128) * 128)
    if D != dim:
        pd = D - dim
        w1 = jnp.pad(w1, ((0, 0), (0, pd)))
        b1 = jnp.pad(b1, ((0, 0), (0, pd)))
        w2 = jnp.pad(w2, ((0, pd), (0, pd)))
        b2 = jnp.pad(b2, ((0, 0), (0, pd)))
        w3 = jnp.pad(w3, ((0, pd), (0, 0)))
    w3_row = w3.T                                   # (1, D) row for lane-wise reduce

    # --- batch tile: sublane-aligned (multiple of 8), large when B allows it,
    #     and pad the batch so the grid divides evenly (extra rows sliced off).
    TB = min(block_b, ((B + 7) // 8) * 8)
    Bp = ((B + TB - 1) // TB) * TB
    if Bp != B:
        x = jnp.pad(x, ((0, Bp - B), (0, 0)))

    resident = lambda shape: pl.BlockSpec(shape, lambda i: (0, 0))  # DMA'd once, stays in VMEM

    out = pl.pallas_call(
        sinusoid_mlp_kernel,
        out_shape=jax.ShapeDtypeStruct((Bp, 1), out_dtype),
        grid_spec=pltpu.PrefetchScalarGridSpec(
            num_scalar_prefetch=0,
            grid=(Bp // TB,),
            in_specs=[
                pl.BlockSpec((TB, 1), lambda i: (i, 0)),              # x tile (pipelined)
                resident((1, D)),                                     # w1 row
                resident((1, D)),                                     # b1
                resident((D, D)),                                     # w2
                resident((1, D)),                                     # b2
                resident((1, D)),                                     # w3 row
                pl.BlockSpec(memory_space=pltpu.MemorySpace.SMEM),    # b3 scalar in SMEM
            ],
            out_specs=pl.BlockSpec((TB, 1), lambda i: (i, 0)),
        ),
        compiler_params=pltpu.CompilerParams(
            dimension_semantics=("parallel",),
        ),
    )(x, w1, b1, w2, b2, w3_row, b3)

    return out[:B]


def init_params(key, dim):
    """Deterministic init mimicking nn.Linear (uniform +/- 1/sqrt(fan_in)),
    returned in (in, out) layout."""
    ks = jax.random.split(key, 6)

    def linear(kw, kb, fan_in, fan_out):
        bound = 1.0 / jnp.sqrt(jnp.float32(fan_in))
        w = jax.random.uniform(kw, (fan_in, fan_out), jnp.float32, -bound, bound)
        b = jax.random.uniform(kb, (1, fan_out), jnp.float32, -bound, bound)
        return w, b

    w1, b1 = linear(ks[0], ks[1], 1, dim)
    w2, b2 = linear(ks[2], ks[3], dim, dim)
    w3, b3 = linear(ks[4], ks[5], dim, 1)
    return w1, b1, w2, b2, w3, b3


def reference(x, w1, b1, w2, b2, w3, b3):
    h1 = jnp.maximum(x @ w1 + b1, 0.0)
    h2 = jnp.maximum(h1 @ w2 + b2, 0.0)
    return h2 @ w3 + b3


if __name__ == "__main__":
    key = jax.random.PRNGKey(0)
    kx, kp = jax.random.split(key)

    B, dim = 8, 32
    x = jax.random.uniform(kx, (B, 1), jnp.float32, -5.0, 5.0)
    params = init_params(kp, dim)

    out = sinusoid_mlp(x, *params)
    out = jax.block_until_ready(out)

    ref = reference(x, *params)
    assert out.shape == (B, 1)
    assert jnp.allclose(out, ref, atol=1e-5, rtol=1e-5), "mismatch vs reference"

    print("KERNEL_OK")
</pallas_src>

<mosaic_0001>
module attributes {stable_mosaic.version = 11 : i64} {
  func.func @sinusoid_mlp_kernel(%arg0: i32, %arg1: memref<8x1xf32, #tpu.memory_space<vmem>>, %arg2: memref<1x128xf32, #tpu.memory_space<vmem>>, %arg3: memref<1x128xf32, #tpu.memory_space<vmem>>, %arg4: memref<128x128xf32, #tpu.memory_space<vmem>>, %arg5: memref<1x128xf32, #tpu.memory_space<vmem>>, %arg6: memref<1x128xf32, #tpu.memory_space<vmem>>, %arg7: memref<1x1xf32, #tpu.memory_space<smem>>, %arg8: memref<8x1xf32, #tpu.memory_space<vmem>>) attributes {dimension_semantics = [#tpu.dimension_semantics<parallel>], iteration_bounds = array<i64: 1>, scalar_prefetch = 0 : i64, scratch_operands = 0 : i64, tpu.core_type = #tpu.core_type<tc>, window_params = [{transform_indices = @transform_0, window_bounds = array<i64: 8, 1>}, {pipeline_mode = #tpu.pipeline_mode<synchronous>, transform_indices = @transform_1, window_bounds = array<i64: 1, 128>}, {pipeline_mode = #tpu.pipeline_mode<synchronous>, transform_indices = @transform_2, window_bounds = array<i64: 1, 128>}, {pipeline_mode = #tpu.pipeline_mode<synchronous>, transform_indices = @transform_3, window_bounds = array<i64: 128, 128>}, {pipeline_mode = #tpu.pipeline_mode<synchronous>, transform_indices = @transform_4, window_bounds = array<i64: 1, 128>}, {pipeline_mode = #tpu.pipeline_mode<synchronous>, transform_indices = @transform_5, window_bounds = array<i64: 1, 128>}, {transform_indices = @transform_6, window_bounds = array<i64: 1, 1>}, {transform_indices = @transform_7, window_bounds = array<i64: 8, 1>}]} {
    %c0 = arith.constant 0 : index
    %c0_0 = arith.constant 0 : index
    %0 = vector.load %arg1[%c0, %c0_0] : memref<8x1xf32, #tpu.memory_space<vmem>>, vector<8x1xf32>
    %c0_1 = arith.constant 0 : index
    %c0_2 = arith.constant 0 : index
    %1 = vector.load %arg2[%c0_1, %c0_2] : memref<1x128xf32, #tpu.memory_space<vmem>>, vector<1x128xf32>
    %2 = vector.broadcast %0 : vector<8x1xf32> to vector<8x128xf32>
    %3 = vector.broadcast %1 : vector<1x128xf32> to vector<8x128xf32>
    %4 = arith.mulf %2, %3 : vector<8x128xf32>
    %c0_3 = arith.constant 0 : index
    %c0_4 = arith.constant 0 : index
    %5 = vector.load %arg3[%c0_3, %c0_4] : memref<1x128xf32, #tpu.memory_space<vmem>>, vector<1x128xf32>
    %6 = vector.broadcast %5 : vector<1x128xf32> to vector<8x128xf32>
    %7 = arith.addf %4, %6 : vector<8x128xf32>
    %cst = arith.constant 0.000000e+00 : f32
    %8 = vector.broadcast %cst : f32 to vector<8x128xf32>
    %9 = arith.maximumf %7, %8 : vector<8x128xf32>
    %c0_5 = arith.constant 0 : index
    %c0_6 = arith.constant 0 : index
    %10 = vector.load %arg4[%c0_5, %c0_6] : memref<128x128xf32, #tpu.memory_space<vmem>>, vector<128x128xf32>
    %cst_7 = arith.constant dense<0.000000e+00> : vector<8x128xf32>
    %11 = tpu.matmul %9, %10, %cst_7 {dimension_numbers = #tpu.dot_dimension_numbers<[1], [0], [0], [1], [0, 0, 1, 1], [], []>} : vector<8x128xf32>, vector<128x128xf32>, vector<8x128xf32> -> vector<8x128xf32>
    %c0_8 = arith.constant 0 : index
    %c0_9 = arith.constant 0 : index
    %12 = vector.load %arg5[%c0_8, %c0_9] : memref<1x128xf32, #tpu.memory_space<vmem>>, vector<1x128xf32>
    %13 = vector.broadcast %12 : vector<1x128xf32> to vector<8x128xf32>
    %14 = arith.addf %11, %13 : vector<8x128xf32>
    %cst_10 = arith.constant 0.000000e+00 : f32
    %15 = vector.broadcast %cst_10 : f32 to vector<8x128xf32>
    %16 = arith.maximumf %14, %15 : vector<8x128xf32>
    %c0_11 = arith.constant 0 : index
    %c0_12 = arith.constant 0 : index
    %17 = vector.load %arg6[%c0_11, %c0_12] : memref<1x128xf32, #tpu.memory_space<vmem>>, vector<1x128xf32>
    %18 = vector.broadcast %17 : vector<1x128xf32> to vector<8x128xf32>
    %19 = arith.mulf %16, %18 : vector<8x128xf32>
    %cst_13 = arith.constant dense<0.000000e+00> : vector<8xf32>
    %20 = vector.multi_reduction <add>, %19, %cst_13 [1] : vector<8x128xf32> to vector<8xf32>
    %21 = vector.shape_cast %20 : vector<8xf32> to vector<8x1xf32>
    %c0_14 = arith.constant 0 : index
    %c0_15 = arith.constant 0 : index
    %22 = memref.load %arg7[%c0_14, %c0_15] : memref<1x1xf32, #tpu.memory_space<smem>>
    %23 = vector.broadcast %22 : f32 to vector<8x1xf32>
    %24 = arith.addf %21, %23 : vector<8x1xf32>
    %c0_16 = arith.constant 0 : index
    %c0_17 = arith.constant 0 : index
    %25 = vector.load %arg8[%c0_16, %c0_17] : memref<8x1xf32, #tpu.memory_space<vmem>>, vector<8x1xf32>
    tpu.vector_store %arg8[%c0_16, %c0_17], %24 {strides = array<i32>} : memref<8x1xf32, #tpu.memory_space<vmem>>, vector<8x1xf32>,
    return
  }
  func.func @transform_0(%arg0: i32) -> (i32, i32) {
    %c0_i32 = arith.constant 0 : i32
    %c0_i32_0 = arith.constant 0 : i32
    return %arg0, %c0_i32 : i32, i32
  }
  func.func @transform_1(%arg0: i32) -> (i32, i32) {
    %c0_i32 = arith.constant 0 : i32
    %c0_i32_0 = arith.constant 0 : i32
    %c0_i32_1 = arith.constant 0 : i32
    return %c0_i32, %c0_i32_0 : i32, i32
  }
  func.func @transform_2(%arg0: i32) -> (i32, i32) {
    %c0_i32 = arith.constant 0 : i32
    %c0_i32_0 = arith.constant 0 : i32
    %c0_i32_1 = arith.constant 0 : i32
    return %c0_i32, %c0_i32_0 : i32, i32
  }
  func.func @transform_3(%arg0: i32) -> (i32, i32) {
    %c0_i32 = arith.constant 0 : i32
    %c0_i32_0 = arith.constant 0 : i32
    %c0_i32_1 = arith.constant 0 : i32
    return %c0_i32, %c0_i32_0 : i32, i32
  }
  func.func @transform_4(%arg0: i32) -> (i32, i32) {
    %c0_i32 = arith.constant 0 : i32
    %c0_i32_0 = arith.constant 0 : i32
    %c0_i32_1 = arith.constant 0 : i32
    return %c0_i32, %c0_i32_0 : i32, i32
  }
  func.func @transform_5(%arg0: i32) -> (i32, i32) {
    %c0_i32 = arith.constant 0 : i32
    %c0_i32_0 = arith.constant 0 : i32
    %c0_i32_1 = arith.constant 0 : i32
    return %c0_i32, %c0_i32_0 : i32, i32
  }
  func.func @transform_6(%arg0: i32) -> (i32, i32) {
    %c0_i32 = arith.constant 0 : i32
    %c0_i32_0 = arith.constant 0 : i32
    %c0_i32_1 = arith.constant 0 : i32
    return %c0_i32, %c0_i32_0 : i32, i32
  }
  func.func @transform_7(%arg0: i32) -> (i32, i32) {
    %c0_i32 = arith.constant 0 : i32
    %c0_i32_0 = arith.constant 0 : i32
    return %arg0, %c0_i32 : i32, i32
  }
}

</mosaic_0001>

<bundles_post_ra>
// kernel: tpu_custom_call.1
= control target key start
LH: loop header
LB: loop body
LE: loop exit
PB: predicated region body
PF: predicated region fallthrough
CT: control target
= control target key end

     0   :  { %13 = vsyncpa [#allocation4], 0  ;;  %s153_s27 = smov [#allocation3]   ;;  %s154_s29 = smov 128   ;;  %s221_s0 = inlined_call_operand.vmem [shape: f32[8,1], index: 0, kind: input, shape index: {}]   ;;  %s222_s1 = inlined_call_operand.vmem [shape: f32[1,128], index: 1, kind: input, shape index: {}]   ;;  %s223_s2 = inlined_call_operand.vmem [shape: f32[1,128], index: 2, kind: input, shape index: {}]   ;;  %s224_s3 = inlined_call_operand.hbm [shape: f32[128,128], index: 3, kind: input, shape index: {}]   ;;  %s225_s4 = inlined_call_operand.vmem [shape: f32[1,128], index: 4, kind: input, shape index: {}]   ;;  %s226_s5 = inlined_call_operand.vmem [shape: f32[1,128], index: 5, kind: input, shape index: {}]   ;;  %s227_s6 = inlined_call_operand.<no memory space> [shape: f32[1,1], index: 6, kind: input, shape index: {}]   ;;  %s228_s7 = inlined_call_operand.vmem [shape: f32[8,1], index: 7, kind: output, shape index: {}]  }
   0x1   :  { %s24_s26 = sshll.u32 %s224_s3, 4  ;;  %s26_s28 = sshll.u32 %s153_s27, 4  ;;  %s25_s26 = int_to_ptr.hbm [resolvable:$true] %s24_s26  ;;  %s27_s28 = int_to_ptr.vmem [resolvable:$true] %s26_s28 }
   0x2   :  { %s155_s30 = smov 8  }
   0x3   :  { %32 = dma.hbm_to_vmem [thread:$0]  %s25_s26, 2048, %s27_s28, [#allocation4], %s154_s29, %s154_s29, %s155_s30  }
   0x4   :  { %151 = dma.done.wait [#allocation4], 2048  }
   0x5   :  { %152 = vsyncadd [#allocation4], 4294965248  ;;  %v156_v0 = vmov 0   ;;  %v43_v1 = vld [vmem:[%s221_s0] sm:$0xff]  ;;  %v75_v2 = vld [vmem:[#allocation3 + $0x78] sm:$0xff]  ;;  %v109_v30 = vstv %s227_s6  ;;  %vm111_vm0 = vcmask 7168  }
   0x6   :  { %122 = vset.pattern.permute.xlu0 %v156_v0  ;;  %v74_v3 = vld [vmem:[#allocation3 + $0x70] sm:$0xff]  ;;  %80 = vmatpush.msra.mxu0 %v75_v2  ;;  %v73_v4 = vld [vmem:[#allocation3 + $0x68] sm:$0xff]  ;;  %v72_v5 = vld [vmem:[#allocation3 + $0x60] sm:$0xff] }
   0x7   :  { %47 = vperm.xlu0 %122, %v43_v1   ;;  %v71_v6 = vld [vmem:[#allocation3 + $0x58] sm:$0xff]  ;;  %v70_v7 = vld [vmem:[#allocation3 + $0x50] sm:$0xff]  ;;  %v69_v8 = vld [vmem:[#allocation3 + $0x48] sm:$0xff] }
   0x8   :  { %81 = vmatpush.msra.mxu0 %v74_v3  ;;  %v68_v9 = vld [vmem:[#allocation3 + $0x40] sm:$0xff]  ;;  %v67_v10 = vld [vmem:[#allocation3 + $0x38] sm:$0xff]  ;;  %v66_v11 = vld [vmem:[#allocation3 + $0x30] sm:$0xff] }
   0x9   :  { %v65_v12 = vld [vmem:[#allocation3 + $0x28] sm:$0xff]  ;;  %v64_v13 = vld [vmem:[#allocation3 + $0x20] sm:$0xff]  ;;  %v63_v14 = vld [vmem:[#allocation3 + $0x18] sm:$0xff] }
   0xa   :  { %82 = vmatpush.msra.mxu0 %v73_v4  ;;  %v62_v15 = vld [vmem:[#allocation3 + $0x10] sm:$0xff]  ;;  %v61_v16 = vld [vmem:[#allocation3 + $0x8] sm:$0xff]  ;;  %v60_v17 = vld [vmem:[#allocation3] sm:$0xff] }
   0xb   :  { %v123_v18 = vld [vmem:[%s222_s1] ss:$0 sm:$0xff] }
   0xc   :  { %83 = vmatpush.msra.mxu0 %v72_v5  ;;  %v124_v19 = vld [vmem:[%s223_s2] ss:$0 sm:$0xff] }
   0xd   :  { %v125_v24 = vld [vmem:[%s225_s4] ss:$0 sm:$0xff] }
   0xe   :  { %84 = vmatpush.msra.mxu0 %v71_v6  ;;  %v126_v27 = vld [vmem:[%s226_s5] ss:$0 sm:$0xff] }
  0x10   :  { %85 = vmatpush.msra.mxu0 %v70_v7 }
  0x12   :  { %86 = vmatpush.msra.mxu0 %v69_v8 }
  0x14   :  { %87 = vmatpush.msra.mxu0 %v68_v9 }
  0x16   :  { %88 = vmatpush.msra.mxu0 %v67_v10 }
  0x18   :  { %89 = vmatpush.msra.mxu0 %v66_v11 }
  0x1a   :  { %90 = vmatpush.msra.mxu0 %v65_v12 }
  0x1c   :  { %91 = vmatpush.msra.mxu0 %v64_v13 }
  0x1e   :  { %92 = vmatpush.msra.mxu0 %v63_v14 }
  0x20   :  { %93 = vmatpush.msra.mxu0 %v62_v15 }
  0x22   :  { %94 = vmatpush.msra.mxu0 %v61_v16 }
  0x24   :  { %95 = vmatpush.msra.mxu0 %v60_v17 }
  0x79   :  { %v48_v20 = vpop.permute.xlu0 %47 }
  0x7a   :  { %v53_v21 = vmul.f32 %v123_v18, %v48_v20 }
  0x7c   :  { %v58_v22 = vadd.f32 %v124_v19, %v53_v21 }
  0x7e   :  { %v59_v23 = vmax.f32 %v58_v22, 0.0 }
  0x80   :  { %96 = vmatmul.f32.vlgmr.msra.gmra.mxu0 %v59_v23 }
  0xfd   :  { %v97_v25 = vpop.f32.mrf.mxu0 }
  0xfe   :  { %v98_v26 = vadd.f32 %v125_v24, %v97_v25 }
 0x100   :  { %v100_v28 = vmax.f32 %v98_v26, 0.0 }
 0x102   :  { %v105_v29 = vmul.f32 %v126_v27, %v100_v28 }
 0x104   :  { %106 = vadd.xlane.f32.xlu0 %v105_v29 }
 0x177   :  { %v107_v31 = vpop.xlane.xlu0 %106 }
 0x178   :  { %v110_v32 = vadd.f32 %v109_v30, %v107_v31 }
 0x17a   :  { %112 = vst.msk [vmem:[%s228_s7] sm:$0xff] %vm111_vm0, %v110_v32 }
 0x17b   :  { %117 = vsyncpa [#allocation4], 1 }

</bundles_post_ra>
